<compile_context>
chip_gen: v7x
topology: tpu7x:2x2x1
jax: 0.10.0
libtpu: 0.0.40
codegen_flags: <defaults>
</compile_context>

<pallas_src>
import math

import jax
import jax.numpy as jnp
from jax.experimental import pallas as pl
from jax.experimental.pallas import tpu as pltpu

BN_EPS = 1e-5
LANE = 128


def _round_up(x, m):
    return (x + m - 1) // m * m


def _pad2(a, rows, cols):
    return jnp.pad(a, ((0, rows - a.shape[0]), (0, cols - a.shape[1])))


def _vmem_budget_bytes():
    """Per-core VMEM budget with headroom (v5e/v6e: 128 MiB phys, v7x: 64 MiB/TC)."""
    try:
        cap = int(pltpu.get_tpu_info().vmem_capacity_bytes)
    except Exception:
        cap = 64 << 20                              # conservative fallback
    if cap <= 0:
        cap = 64 << 20
    return max(16 << 20, min(96 << 20, (cap * 3) // 4))


# ---------------------------------------------------------------------------
# Kernel 1: per-feature batch statistics (sum, sum of squares) over batch tiles.
# Output block index is constant across the grid -> VMEM-resident accumulator.
# ---------------------------------------------------------------------------
def _bn_stats_kernel(x_ref, acc_ref):
    @pl.when(pl.program_id(0) == 0)
    def _():
        acc_ref[...] = jnp.zeros_like(acc_ref)

    x = x_ref[...]                                   # f32 (tb_stats, D)
    acc_ref[0:1, :] += jnp.sum(x, axis=0, keepdims=True)
    acc_ref[1:2, :] += jnp.sum(x * x, axis=0, keepdims=True)


def _pick_stats_tile(b_pad, d, budget):
    """Large multiple-of-8 row tile for the HBM-bound stats pass that divides b_pad."""
    limit = min(budget // 2, 16 << 20)
    cap = min(b_pad, 1024)
    while cap > 8 and 2 * cap * d * 4 > limit:       # double-buffered f32 tile
        cap = max(8, (cap // 2) // 8 * 8)
    cand = (cap // 8) * 8
    while cand > 8 and b_pad % cand != 0:
        cand -= 8
    return max(cand, 8)


def _batch_stats(x_p, tb, budget):
    """x_p: row-zero-padded (B_pad, D) f32.  Returns (2, D): [sum; sumsq]."""
    b_pad, d = x_p.shape
    est = 2 * tb * d * 4 + 2 * d * 4 + (2 << 20)
    vmem_limit = int(min(budget, max(16 << 20, 2 * est)))
    cost = pl.CostEstimate(flops=3 * b_pad * d, transcendentals=0,
                           bytes_accessed=b_pad * d * 4 + 2 * d * 4)
    return pl.pallas_call(
        _bn_stats_kernel,
        out_shape=jax.ShapeDtypeStruct((2, d), jnp.float32),
        grid=(b_pad // tb,),
        in_specs=[pl.BlockSpec((tb, d), lambda i: (i, 0))],
        out_specs=pl.BlockSpec((2, d), lambda i: (0, 0)),
        compiler_params=pltpu.CompilerParams(
            dimension_semantics=("arbitrary",),      # reduction over batch tiles
            vmem_limit_bytes=vmem_limit,
        ),
        cost_estimate=cost,
    )(x_p)


# ---------------------------------------------------------------------------
# Kernel 2: batch-tiled MLP (Linear+ReLU stack + value head), BN pre-folded.
# ---------------------------------------------------------------------------
def _make_mlp_kernel(num_hidden_layers):
    def kernel(x_ref, *refs):
        out_ref = refs[-1]
        wb = refs[:-1]                               # [w0, b0, ..., wv, bv]

        h = x_ref[...]                               # bf16 (tb, D), no upcast needed
        for i in range(num_hidden_layers):
            w = wb[2 * i][...]                       # bf16 (K, N_pad), VMEM-resident
            b = wb[2 * i + 1][...]                   # f32  (1, N_pad)
            y = jnp.dot(h, w, preferred_element_type=jnp.float32) + b
            h = jnp.maximum(y, 0.0).astype(jnp.bfloat16)   # ReLU + downcast, once

        wv = wb[-2][...]
        bv = wb[-1][...]
        out_ref[...] = jnp.dot(h, wv, preferred_element_type=jnp.float32) + bv

    return kernel


def _vmem_estimate(tb, d_in, dims_pad, weight_buffers=2):
    """Rough VMEM footprint (bytes) of the tiled MLP kernel."""
    dims = [d_in] + list(dims_pad)
    x_bytes = 2 * tb * d_in * 2                      # double-buffered bf16 input tile
    out_bytes = 2 * tb * dims_pad[-1] * 4            # double-buffered f32 output tile
    w_bytes = 0
    for k, n in zip(dims[:-1], dims[1:]):
        w_bytes += k * n * 2 + n * 4                 # bf16 weights + f32 biases
    w_bytes *= weight_buffers
    act_bytes = 3 * tb * max(dims) * 4               # live activations (f32 slack)
    return x_bytes + out_bytes + w_bytes + act_bytes + (4 << 20)


def mappo_critic_forward(state, gamma, beta, hidden_params, v_params, *, block_b=None):
    """Forward pass of MAPPOCritic.

    state:  (B, num_agents, state_dim) float32
    gamma, beta: (D,) BatchNorm1d affine params, D = num_agents * state_dim
    hidden_params: list of (W (in, out), b (1, out) or (out,))
    v_params: (W_v (hidden[-1], num_agents), b_v)
    Returns v: (B, num_agents) float32.
    """
    B = state.shape[0]
    x = state.reshape(B, -1).astype(jnp.float32)     # == state.view(B, -1)
    D = x.shape[1]
    num_agents = v_params[0].shape[1]

    widths = [w.shape[1] for (w, _) in hidden_params]
    widths_pad = [_round_up(h, LANE) for h in widths]
    n_out_pad = _round_up(num_agents, LANE)
    dims_pad = widths_pad + [n_out_pad]              # N dims (K of layer0 stays = D)

    budget = _vmem_budget_bytes()

    # ---- batch-tile choice (large M for the MXU, bounded by VMEM budget) ----
    if block_b is None:
        tb = _round_up(min(max(B, 16), 512), 16)     # bf16-friendly sublane multiple
    else:
        assert block_b % 8 == 0, "block_b must be a multiple of 8"
        tb = block_b

    weight_buffers = 2
    while _vmem_estimate(tb, D, dims_pad, weight_buffers) > budget:
        if weight_buffers == 2:
            weight_buffers = 1                       # single-buffer resident weights first
            continue
        if block_b is not None or tb <= 8:
            break
        tb = max(8, _round_up(tb // 2, 8))
    b_pad = _round_up(B, tb)

    # Row-padded views of x: f32 for the stats pass, bf16 for the (BN-folded) MLP.
    x_f32 = _pad2(x, b_pad, D)
    x_bf16 = x_f32.astype(jnp.bfloat16)

    # ---- BatchNorm1d training-mode batch statistics (Pallas reduction) ----
    tb_stats = _pick_stats_tile(b_pad, D, budget)
    stats = _batch_stats(x_f32, tb_stats, budget)
    mean = stats[0] / B                              # zero-padded rows add nothing
    # Single-pass E[x^2]-E[x]^2 in f32 (biased, training mode); adequate at this tol.
    var = jnp.maximum(stats[1] / B - mean * mean, 0.0)
    inv_std = jax.lax.rsqrt(var + BN_EPS)

    gamma_f = gamma.reshape(-1).astype(jnp.float32)
    beta_f = beta.reshape(-1).astype(jnp.float32)
    scale = gamma_f * inv_std                        # (D,)
    shift = beta_f - mean * scale                    # (D,)

    # ---- pad params (N lanes only), fold BN into the first Linear, cast to bf16 ----
    flat = []
    in_dims = [D] + widths_pad
    for li, (w, b) in enumerate(hidden_params):
        wp = _pad2(w.astype(jnp.float32), in_dims[li], widths_pad[li])
        bp = _pad2(b.reshape(1, -1).astype(jnp.float32), 1, widths_pad[li])
        if li == 0:
            # BN(x) @ W + b == x @ (scale[:,None] * W) + (shift @ W + b)
            bp = bp + shift[None, :] @ wp
            wp = wp * scale[:, None]
        flat.append(wp.astype(jnp.bfloat16))
        flat.append(bp)                              # biases stay f32
    wv, bv = v_params
    wv_p = _pad2(wv.astype(jnp.float32), widths_pad[-1], n_out_pad).astype(jnp.bfloat16)
    bv_p = _pad2(bv.reshape(1, -1).astype(jnp.float32), 1, n_out_pad)
    flat.extend([wv_p, bv_p])

    # ---- block specs: x / out tiled over the batch, params VMEM-resident ----
    in_specs = [pl.BlockSpec((tb, D), lambda i: (i, 0))]
    for arr in flat:
        if weight_buffers == 1:
            in_specs.append(pl.BlockSpec(arr.shape, lambda i: (0, 0),
                                         pipeline_mode=pl.Buffered(1)))
        else:
            in_specs.append(pl.BlockSpec(arr.shape, lambda i: (0, 0)))
    out_spec = pl.BlockSpec((tb, n_out_pad), lambda i: (i, 0))   # lane-dense stores

    est = _vmem_estimate(tb, D, dims_pad, weight_buffers)
    vmem_limit = int(min(budget, max(16 << 20, est + (4 << 20))))

    dims_all = [D] + dims_pad
    mlp_flops = 2 * b_pad * sum(k * n for k, n in zip(dims_all[:-1], dims_all[1:]))
    mlp_bytes = (b_pad * D * 2 + b_pad * n_out_pad * 4
                 + sum(k * n * 2 + n * 4 for k, n in zip(dims_all[:-1], dims_all[1:])))
    cost = pl.CostEstimate(flops=int(mlp_flops), transcendentals=0,
                           bytes_accessed=int(mlp_bytes))

    out = pl.pallas_call(
        _make_mlp_kernel(len(hidden_params)),
        out_shape=jax.ShapeDtypeStruct((b_pad, n_out_pad), jnp.float32),
        grid=(b_pad // tb,),
        in_specs=in_specs,
        out_specs=out_spec,
        compiler_params=pltpu.CompilerParams(
            dimension_semantics=("parallel",),       # independent batch tiles
            vmem_limit_bytes=vmem_limit,
        ),
        cost_estimate=cost,
    )(x_bf16, *flat)

    return out[:B, :num_agents]


# ---------------------------------------------------------------------------
# Parameter init matching the PyTorch module, and a pure-JAX reference.
# ---------------------------------------------------------------------------
def _xavier_uniform(key, fan_in, fan_out):
    # matches torch.nn.init.xavier_uniform_ with gain=1
    bound = math.sqrt(6.0 / (fan_in + fan_out))
    return jax.random.uniform(key, (fan_in, fan_out), jnp.float32, -bound, bound)


def _linear_bias(key, fan_in, fan_out):
    # matches PyTorch Linear default bias init: U(-1/sqrt(fan_in), 1/sqrt(fan_in))
    bound = 1.0 / math.sqrt(fan_in)
    return jax.random.uniform(key, (1, fan_out), jnp.float32, -bound, bound)


def _reference_forward(state, gamma, beta, hidden_params, v_params):
    B = state.shape[0]
    x = state.reshape(B, -1).astype(jnp.float32)
    mean = jnp.mean(x, axis=0)
    var = jnp.var(x, axis=0)                         # biased (training mode)
    x = (x - mean) * jax.lax.rsqrt(var + BN_EPS) * gamma + beta
    for w, b in hidden_params:
        x = jnp.maximum(x @ w + b.reshape(1, -1), 0.0)
    wv, bv = v_params
    return x @ wv + bv.reshape(1, -1)


if __name__ == "__main__":
    # Small deterministic config.
    batch = 32
    num_agents = 2
    state_dim = 4
    hidden_size = [32, 32]
    D = state_dim * num_agents

    key = jax.random.PRNGKey(0)
    keys = jax.random.split(key, 2 * (len(hidden_size) + 1) + 1)

    # BatchNorm1d affine params (default init: gamma=1, beta=0).
    gamma = jnp.ones((D,), jnp.float32)
    beta = jnp.zeros((D,), jnp.float32)

    # Hidden Linear layers (xavier_uniform weights from init_weights, default bias).
    dims = [D] + hidden_size
    hidden_params = []
    ki = 0
    for i in range(len(hidden_size)):
        w = _xavier_uniform(keys[ki], dims[i], dims[i + 1]); ki += 1
        b = _linear_bias(keys[ki], dims[i], dims[i + 1]); ki += 1
        hidden_params.append((w, b))

    # Value head.
    wv = _xavier_uniform(keys[ki], hidden_size[-1], num_agents); ki += 1
    bv = _linear_bias(keys[ki], hidden_size[-1], num_agents); ki += 1

    state = jax.random.normal(keys[ki], (batch, num_agents, state_dim), jnp.float32)

    # block_b=16 forces a multi-tile grid even at this small demo batch,
    # exercising the pipelined / VMEM-resident-weight path (16 = bf16 sublane pack).
    v = mappo_critic_forward(state, gamma, beta, hidden_params, (wv, bv), block_b=16)
    v = jax.block_until_ready(v)

    assert v.shape == (batch, num_agents)
    assert v.dtype == jnp.float32

    v_ref = _reference_forward(state, gamma, beta, hidden_params, (wv, bv))
    max_err = float(jnp.max(jnp.abs(v - v_ref)))
    assert jnp.allclose(v, v_ref, rtol=5e-2, atol=5e-2), f"max abs err {max_err}"

    print("KERNEL_OK")
</pallas_src>

<mosaic_0001>
module attributes {stable_mosaic.version = 11 : i64} {
  func.func @_bn_stats_kernel(%arg0: i32, %arg1: memref<32x8xf32, #tpu.memory_space<vmem>>, %arg2: memref<2x8xf32, #tpu.memory_space<vmem>>) attributes {dimension_semantics = [#tpu.dimension_semantics<arbitrary>], iteration_bounds = array<i64: 1>, scalar_prefetch = 0 : i64, scratch_operands = 0 : i64, tpu.core_type = #tpu.core_type<tc>, window_params = [{transform_indices = @transform_0, window_bounds = array<i64: 32, 8>}, {pipeline_mode = #tpu.pipeline_mode<synchronous>, transform_indices = @transform_1, window_bounds = array<i64: 2, 8>}]} {
    %c0_i32 = arith.constant 0 : i32
    %0 = arith.cmpi eq, %arg0, %c0_i32 : i32
    %1 = arith.extui %0 : i1 to i32
    %c0_i32_0 = arith.constant 0 : i32
    %2 = arith.cmpi ne, %1, %c0_i32_0 : i32
    scf.if %2 {
      %cst_10 = arith.constant 0.000000e+00 : f32
      %15 = vector.broadcast %cst_10 : f32 to vector<2x8xf32>
      %c0_11 = arith.constant 0 : index
      %c0_12 = arith.constant 0 : index
      %16 = vector.load %arg2[%c0_11, %c0_12] : memref<2x8xf32, #tpu.memory_space<vmem>>, vector<2x8xf32>
      tpu.vector_store %arg2[%c0_11, %c0_12], %15 {strides = array<i32>} : memref<2x8xf32, #tpu.memory_space<vmem>>, vector<2x8xf32>,
    } else {
    }
    %c0 = arith.constant 0 : index
    %c0_1 = arith.constant 0 : index
    %3 = vector.load %arg1[%c0, %c0_1] : memref<32x8xf32, #tpu.memory_space<vmem>>, vector<32x8xf32>
    %c0_2 = arith.constant 0 : index
    %c0_3 = arith.constant 0 : index
    %4 = vector.load %arg2[%c0_2, %c0_3] : memref<2x8xf32, #tpu.memory_space<vmem>>, vector<1x8xf32>
    %cst = arith.constant dense<0.000000e+00> : vector<8xf32>
    %5 = vector.multi_reduction <add>, %3, %cst [0] : vector<32x8xf32> to vector<8xf32>
    %6 = vector.shape_cast %5 : vector<8xf32> to vector<1x8xf32>
    %7 = arith.addf %4, %6 : vector<1x8xf32>
    %c0_4 = arith.constant 0 : index
    %c0_5 = arith.constant 0 : index
    %8 = vector.load %arg2[%c0_4, %c0_5] : memref<2x8xf32, #tpu.memory_space<vmem>>, vector<1x8xf32>
    tpu.vector_store %arg2[%c0_4, %c0_5], %7 {strides = array<i32>} : memref<2x8xf32, #tpu.memory_space<vmem>>, vector<1x8xf32>,
    %c1 = arith.constant 1 : index
    %c0_6 = arith.constant 0 : index
    %9 = vector.load %arg2[%c1, %c0_6] : memref<2x8xf32, #tpu.memory_space<vmem>>, vector<1x8xf32>
    %10 = arith.mulf %3, %3 : vector<32x8xf32>
    %cst_7 = arith.constant dense<0.000000e+00> : vector<8xf32>
    %11 = vector.multi_reduction <add>, %10, %cst_7 [0] : vector<32x8xf32> to vector<8xf32>
    %12 = vector.shape_cast %11 : vector<8xf32> to vector<1x8xf32>
    %13 = arith.addf %9, %12 : vector<1x8xf32>
    %c1_8 = arith.constant 1 : index
    %c0_9 = arith.constant 0 : index
    %14 = vector.load %arg2[%c1_8, %c0_9] : memref<2x8xf32, #tpu.memory_space<vmem>>, vector<1x8xf32>
    tpu.vector_store %arg2[%c1_8, %c0_9], %13 {strides = array<i32>} : memref<2x8xf32, #tpu.memory_space<vmem>>, vector<1x8xf32>,
    return
  }
  func.func @transform_0(%arg0: i32) -> (i32, i32) {
    %c0_i32 = arith.constant 0 : i32
    %c0_i32_0 = arith.constant 0 : i32
    return %arg0, %c0_i32 : i32, i32
  }
  func.func @transform_1(%arg0: i32) -> (i32, i32) {
    %c0_i32 = arith.constant 0 : i32
    %c0_i32_0 = arith.constant 0 : i32
    %c0_i32_1 = arith.constant 0 : i32
    return %c0_i32, %c0_i32_0 : i32, i32
  }
}

</mosaic_0001>

<bundles_post_ra>
// kernel: tpu_custom_call.1
= control target key start
LH: loop header
LB: loop body
LE: loop exit
PB: predicated region body
PF: predicated region fallthrough
CT: control target
= control target key end

     0   :  { %vm13_vm0 = vcmask 58368   ;;  %vm20_vm1 = vcmask 64512   ;;  %v97_v3 = vmov 0.0   ;;  %s141_s0 = inlined_call_operand.vmem [shape: f32[32,8], index: 0, kind: input, shape index: {}]   ;;  %s142_s1 = inlined_call_operand.hbm [shape: f32[2,8], index: 1, kind: output, shape index: {}]  }
   0x1   :  { %v15_v0 = vld [vmem:[%s141_s0] sm:$0xff]  ;;  %v16_v1 = vld [vmem:[%s141_s0 + $0x8] sm:$0xff]  ;;  %v17_v2 = vld [vmem:[%s141_s0 + $0x10] sm:$0xff]  ;;  %14 = vst.msk [vmem:[#allocation2] sm:$0x3] %vm13_vm0, %v97_v3 }
   0x2   :  { %v18_v4 = vld [vmem:[%s141_s0 + $0x18] sm:$0xff]  ;;  %v21_v5 = vsel %vm20_vm1, %v15_v0, 0.0  ;;  %v22_v6 = vsel %vm20_vm1, %v16_v1, 0.0  ;;  %v24_v7 = vsel %vm20_vm1, %v17_v2, 0.0  ;;  %v38_v9 = vmul.f32 %v15_v0, %v15_v0 }
   0x3   :  { %v23_v8 = vadd.f32 %v22_v6, %v21_v5  ;;  %v39_v10 = vmul.f32 %v16_v1, %v16_v1 }
   0x4   :  { %6 = vsyncpa [#allocation3], 0  ;;  %v26_v11 = vsel %vm20_vm1, %v18_v4, 0.0  ;;  %v40_v12 = vmul.f32 %v17_v2, %v17_v2  ;;  %v41_v13 = vmul.f32 %v18_v4, %v18_v4  ;;  %v42_v15 = vsel %vm20_vm1, %v38_v9, 0.0  ;;  %s98_s0 = smov [#allocation2]  }
   0x5   :  { %v25_v14 = vadd.f32 %v24_v7, %v23_v8  ;;  %v43_v16 = vsel %vm20_vm1, %v39_v10, 0.0  ;;  %vm35_vm2 = vcmask 57344   ;;  %s63_s14 = sshll.u32 %s98_s0, 4  ;;  %s64_s14 = int_to_ptr.vmem [resolvable:$true] %s63_s14 }
   0x6   :  { %v44_v17 = vadd.f32 %v43_v16, %v42_v15  ;;  %v45_v18 = vsel %vm20_vm1, %v40_v12, 0.0  ;;  %v47_v20 = vsel %vm20_vm1, %v41_v13, 0.0  ;;  %s73_s15 = scalar_lea.vmem %s64_s14, 32  ;;  %p78_p1 = scmp.lt.s32.totalorder %s64_s14, %s64_s14 }
   0x7   :  { %v27_v19 = vadd.f32 %v26_v11, %v25_v14  ;;  %p74_p0 = scmp.ne.s32.totalorder %s64_s14, %s73_s15  ;;  %p79_p2 = scmp.lt.s32.totalorder %s73_s15, %s73_s15 }
   0x8   :  { %v46_v21 = vadd.f32 %v45_v18, %v44_v17  ;;  %v19_v31 = vld [vmem:[#allocation2] sm:$0x1]  ;;  %v37_v36 = vld [vmem:[#allocation2 + $0x1] sm:$0x1] }
   0x9   :  { %v28_v22 = vrot.slane %v27_v19, 4  ;;  %p80_p3 = por %p79_p2, %p78_p1 }
   0xa   :  { %v48_v23 = vadd.f32 %v47_v20, %v46_v21 }
   0xb   :  { %v29_v24 = vadd.f32 %v28_v22, %v27_v19  ;;  %p81_p4 = pnand %p80_p3, %p74_p0 }
   0xc   :  { %v49_v25 = vrot.slane %v48_v23, 4 }
   0xd   :  { %v30_v26 = vrot.slane %v29_v24, 2 }
   0xe   :  { %v50_v27 = vadd.f32 %v49_v25, %v48_v23 }
   0xf   :  { %v31_v28 = vadd.f32 %v30_v26, %v29_v24 }
  0x10   :  { %v51_v29 = vrot.slane %v50_v27, 2 }
  0x11   :  { %v32_v30 = vrot.slane %v31_v28, 1 }
  0x12   :  { %v52_v32 = vadd.f32 %v51_v29, %v50_v27 }
  0x13   :  { %v33_v33 = vadd.f32 %v32_v30, %v31_v28 }
  0x14   :  { %v53_v34 = vrot.slane %v52_v32, 1 }
  0x15   :  { %v34_v35 = vadd.f32 %v33_v33, %v19_v31 }
  0x16   :  { %v54_v37 = vadd.f32 %v53_v34, %v52_v32 }
  0x17   :  { %36 = vst.msk [vmem:[#allocation2] sm:$0x1] %vm35_vm2, %v34_v35 }
  0x18   :  { %v55_v38 = vadd.f32 %v54_v37, %v37_v36 }
  0x1a   :  { %56 = vst.msk [vmem:[#allocation2 + $0x1] sm:$0x1] %vm35_vm2, %v55_v38 }
  0x1b   :  { %84 = shalt.err (!%p81_p4)
}
  0x1c   :  { %s85_s18 = scalar_lea.hbm %s142_s1, 32 }
  0x1d   :  { %p86_p5 = scmp.ne.s32.totalorder %s142_s1, %s85_s18  ;;  %p89_p6 = scmp.lt.u32.totalorder %s85_s18, %s142_s1 }
  0x1f   :  { %p91_p7 = pnand %p89_p6, %p86_p5 }
  0x21   :  { %94 = shalt.err (!%p91_p7)
}
  0x22   :  { %66 = dma.vmem_to_hbm [thread:$0]  %s64_s14, 32, %s142_s1, [#allocation3]  }
  0x23   :  { %95 = dma.done.wait [#allocation3], 32  }
  0x24   :  { %96 = vsyncadd [#allocation3], 4294967264 }
  0x25   :  { %70 = vsyncpa [#allocation3], 1 }

</bundles_post_ra>
